<compile_context>
chip_gen: v6e
topology: v6e:2x2x1
jax: 0.10.0
libtpu: 0.0.40
codegen_flags: <defaults>
</compile_context>

<pallas_src>
import functools

import jax
import jax.numpy as jnp
from jax.experimental import pallas as pl
from jax.experimental.pallas import tpu as pltpu

# Keep this padding constant in f32: it would overflow to -inf if b2 were ever
# stored in bf16 (still correct for softmax, but avoid the surprise).
_NEG_INF = -1e30


def gnet_kernel(x_ref, w1_ref, b1_ref, w2_ref, b2_ref, out_ref):
    # Layer 1: h1[b, h] = relu(x[b] * w1[h] + b1[h])
    # (TB,1)*(1,H_pad) broadcast on the VPU -- no MXU push for a K=1 contraction.
    h1 = jnp.maximum(x_ref[...] * w1_ref[...] + b1_ref[...], 0.0)

    # Layer 2: (TB, H_pad) @ (H_pad, O_pad) on the MXU, f32 accumulation.
    # Padded hidden units are exact zeros, padded output columns carry b2=-1e30.
    logits = jnp.dot(h1, w2_ref[...], preferred_element_type=jnp.float32) + b2_ref[...]

    # Softmax over the padded lane axis; the -1e30 bias on padded columns makes
    # them exp() to 0, so the sum equals the sum over the real O columns.
    m = jnp.max(logits, axis=1, keepdims=True)
    e = jnp.exp(logits - m)
    denom = jnp.sum(e, axis=1, keepdims=True)
    probs = e / denom  # exact divide: EUP has slack; keeps row-sums == 1

    # Compact store: only the real O columns go back to HBM (masked vst, but far
    # cheaper than 16x padded DMA write traffic at O=8).
    num_out = out_ref.shape[-1]
    out_ref[...] = probs[:, :num_out].astype(out_ref.dtype)


def _round_up(n, m):
    return (n + m - 1) // m * m


def _cdiv(a, b):
    return -(-a // b)


def _pick_batch_tile(B, tb):
    """Batch tile: multiple of 8, as large as `tb` allows (per-step overhead is
    ~0.35us; 512-1024 row tiles sit near the HBM roofline).  When the batch
    permits, force an even tile count >= 2 so v7x's two TensorCores both get
    work along the 'parallel' grid axis (no-op on single-TC v5e/v6e)."""
    B8 = _round_up(max(B, 8), 8)
    TB = min(_round_up(tb, 8), B8)
    nt = _cdiv(B8, TB)
    if nt == 1 and B8 >= 16:
        TB = _round_up(_cdiv(B8, 2), 8)
    elif nt > 1 and nt % 2 == 1:
        TB = _round_up(_cdiv(B8, nt + 1), 8)
    return TB


def prepare_gnet_params(w1, b1, w2, b2):
    """Pad parameters ONCE (hoisted out of the per-call forward).

    Hidden dim is zero-padded (relu(0*x+0)=0 contributes nothing to layer 2);
    output columns >= O get b2 = -1e30 so they vanish inside the softmax.
    """
    H, O = w2.shape
    H_pad = _round_up(H, 128)
    O_pad = _round_up(O, 128)
    w1_p = jnp.zeros((1, H_pad), jnp.float32).at[:, :H].set(w1.astype(jnp.float32))
    b1_p = jnp.zeros((1, H_pad), jnp.float32).at[:, :H].set(b1.astype(jnp.float32))
    w2_p = jnp.zeros((H_pad, O_pad), jnp.float32).at[:H, :O].set(w2.astype(jnp.float32))
    b2_p = jnp.full((1, O_pad), _NEG_INF, jnp.float32).at[:, :O].set(b2.astype(jnp.float32))
    return w1_p, b1_p, w2_p, b2_p


@functools.partial(jax.jit, static_argnames=("num_outputs", "tb"))
def gnet_forward(x, w1_p, b1_p, w2_p, b2_p, *, num_outputs, tb=1024):
    """x: (B,1); padded params from prepare_gnet_params -> softmax probs (B, O)."""
    B = x.shape[0]
    H_pad = w1_p.shape[1]
    O_pad = w2_p.shape[1]
    O = num_outputs

    TB = _pick_batch_tile(B, tb)
    B_pad = _round_up(B, TB)
    num_tiles = B_pad // TB

    # Zero-pad the batch only (rows >= B produce garbage probs that are sliced off).
    x_p = jnp.zeros((B_pad, 1), jnp.float32).at[:B, :].set(x.astype(jnp.float32))

    # VMEM budget: (TB,1) x tiles lane-pad to TBx128, out tiles lane-pad to
    # TB x round_up(O,128) in VMEM; both are double-buffered.  Pinned weights are
    # also double-buffered by default.  Add room for h1/logits/exp intermediates.
    O_lane = _round_up(O, 128)
    vmem_est = 4 * (
        2 * TB * 128                                 # x tiles (lane-padded)
        + 2 * TB * O_lane                            # out tiles (lane-padded in VMEM)
        + 2 * (H_pad * O_pad + 2 * H_pad + O_pad)    # pinned weights
        + 4 * TB * max(H_pad, O_pad)                 # intermediates
    )
    vmem_limit = max(16 << 20, min(vmem_est + (2 << 20), 48 << 20))  # <=48MiB for v7x

    cost = pl.CostEstimate(
        flops=2 * B_pad * H_pad * O_pad + 4 * B_pad * H_pad,
        transcendentals=B_pad * O_pad,
        bytes_accessed=4 * (B_pad + B_pad * O + H_pad * O_pad + 2 * H_pad + O_pad),
    )

    out_p = pl.pallas_call(
        gnet_kernel,
        out_shape=jax.ShapeDtypeStruct((B_pad, O), jnp.float32),
        grid=(num_tiles,),
        in_specs=[
            pl.BlockSpec((TB, 1), lambda i: (i, 0)),          # x tile (per grid step)
            pl.BlockSpec((1, H_pad), lambda i: (0, 0)),       # w1 pinned in VMEM
            pl.BlockSpec((1, H_pad), lambda i: (0, 0)),       # b1 pinned
            pl.BlockSpec((H_pad, O_pad), lambda i: (0, 0)),   # w2 pinned
            pl.BlockSpec((1, O_pad), lambda i: (0, 0)),       # b2 pinned (pad = -1e30)
        ],
        # Compact output block: last dim == full array dim O (legal, masked vst).
        out_specs=pl.BlockSpec((TB, O), lambda i: (i, 0)),
        compiler_params=pltpu.CompilerParams(
            dimension_semantics=("parallel",),   # shard batch tiles across TCs on v7x
            vmem_limit_bytes=vmem_limit,
        ),
        cost_estimate=cost,
    )(x_p, w1_p, b1_p, w2_p, b2_p)

    return out_p[:B]


def init_gnet_params(key, nr_hidden_nodes, nr_output_nodes):
    """Deterministic init mimicking nn.Linear's U(-1/sqrt(fan_in), 1/sqrt(fan_in))."""
    k1, k2, k3, k4 = jax.random.split(key, 4)
    bound1 = 1.0 / jnp.sqrt(1.0)                      # fan_in of l1 = 1
    bound2 = 1.0 / jnp.sqrt(float(nr_hidden_nodes))   # fan_in of l2 = H
    w1 = jax.random.uniform(k1, (1, nr_hidden_nodes), jnp.float32, -bound1, bound1)
    b1 = jax.random.uniform(k2, (1, nr_hidden_nodes), jnp.float32, -bound1, bound1)
    w2 = jax.random.uniform(k3, (nr_hidden_nodes, nr_output_nodes), jnp.float32,
                            -bound2, bound2)
    b2 = jax.random.uniform(k4, (1, nr_output_nodes), jnp.float32, -bound2, bound2)
    return w1, b1, w2, b2


if __name__ == "__main__":
    key = jax.random.PRNGKey(0)
    kx, kp = jax.random.split(key)

    B = 300          # batch (non-multiple of tile size -> exercises padding path)
    H = 32           # nr_hidden_nodes
    O = 8            # nr_output_nodes

    x = jax.random.normal(kx, (B, 1), dtype=jnp.float32)
    w1, b1, w2, b2 = init_gnet_params(kp, H, O)

    # Pad weights once, outside the jitted forward.
    w1_p, b1_p, w2_p, b2_p = prepare_gnet_params(w1, b1, w2, b2)

    out = gnet_forward(x, w1_p, b1_p, w2_p, b2_p, num_outputs=O, tb=1024)
    out = jax.block_until_ready(out)

    # Sanity check against plain-JAX reference (same semantics as the torch forward).
    h1_ref = jnp.maximum(x @ w1 + b1, 0.0)
    ref = jax.nn.softmax(h1_ref @ w2 + b2, axis=1)

    assert out.shape == (B, O)
    assert jnp.allclose(out, ref, atol=1e-5, rtol=1e-5)
    assert jnp.allclose(jnp.sum(out, axis=1), 1.0, atol=1e-5)

    print("KERNEL_OK")
</pallas_src>

<mosaic_0001>
module attributes {stable_mosaic.version = 11 : i64} {
  func.func @gnet_kernel(%arg0: i32, %arg1: memref<152x1xf32, #tpu.memory_space<vmem>>, %arg2: memref<1x128xf32, #tpu.memory_space<vmem>>, %arg3: memref<1x128xf32, #tpu.memory_space<vmem>>, %arg4: memref<128x128xf32, #tpu.memory_space<vmem>>, %arg5: memref<1x128xf32, #tpu.memory_space<vmem>>, %arg6: memref<152x8xf32, #tpu.memory_space<vmem>>) attributes {dimension_semantics = [#tpu.dimension_semantics<parallel>], iteration_bounds = array<i64: 2>, scalar_prefetch = 0 : i64, scratch_operands = 0 : i64, tpu.core_type = #tpu.core_type<tc>, window_params = [{transform_indices = @transform_0, window_bounds = array<i64: 152, 1>}, {pipeline_mode = #tpu.pipeline_mode<synchronous>, transform_indices = @transform_1, window_bounds = array<i64: 1, 128>}, {pipeline_mode = #tpu.pipeline_mode<synchronous>, transform_indices = @transform_2, window_bounds = array<i64: 1, 128>}, {pipeline_mode = #tpu.pipeline_mode<synchronous>, transform_indices = @transform_3, window_bounds = array<i64: 128, 128>}, {pipeline_mode = #tpu.pipeline_mode<synchronous>, transform_indices = @transform_4, window_bounds = array<i64: 1, 128>}, {transform_indices = @transform_5, window_bounds = array<i64: 152, 8>}]} {
    %c0 = arith.constant 0 : index
    %c0_0 = arith.constant 0 : index
    %0 = vector.load %arg1[%c0, %c0_0] : memref<152x1xf32, #tpu.memory_space<vmem>>, vector<152x1xf32>
    %c0_1 = arith.constant 0 : index
    %c0_2 = arith.constant 0 : index
    %1 = vector.load %arg2[%c0_1, %c0_2] : memref<1x128xf32, #tpu.memory_space<vmem>>, vector<1x128xf32>
    %2 = vector.broadcast %0 : vector<152x1xf32> to vector<152x128xf32>
    %3 = vector.broadcast %1 : vector<1x128xf32> to vector<152x128xf32>
    %4 = arith.mulf %2, %3 : vector<152x128xf32>
    %c0_3 = arith.constant 0 : index
    %c0_4 = arith.constant 0 : index
    %5 = vector.load %arg3[%c0_3, %c0_4] : memref<1x128xf32, #tpu.memory_space<vmem>>, vector<1x128xf32>
    %6 = vector.broadcast %5 : vector<1x128xf32> to vector<152x128xf32>
    %7 = arith.addf %4, %6 : vector<152x128xf32>
    %cst = arith.constant 0.000000e+00 : f32
    %8 = vector.broadcast %cst : f32 to vector<152x128xf32>
    %9 = arith.maximumf %7, %8 : vector<152x128xf32>
    %c0_5 = arith.constant 0 : index
    %c0_6 = arith.constant 0 : index
    %10 = vector.load %arg4[%c0_5, %c0_6] : memref<128x128xf32, #tpu.memory_space<vmem>>, vector<128x128xf32>
    %cst_7 = arith.constant dense<0.000000e+00> : vector<152x128xf32>
    %11 = tpu.matmul %9, %10, %cst_7 {dimension_numbers = #tpu.dot_dimension_numbers<[1], [0], [0], [1], [0, 0, 1, 1], [], []>} : vector<152x128xf32>, vector<128x128xf32>, vector<152x128xf32> -> vector<152x128xf32>
    %c0_8 = arith.constant 0 : index
    %c0_9 = arith.constant 0 : index
    %12 = vector.load %arg5[%c0_8, %c0_9] : memref<1x128xf32, #tpu.memory_space<vmem>>, vector<1x128xf32>
    %13 = vector.broadcast %12 : vector<1x128xf32> to vector<152x128xf32>
    %14 = arith.addf %11, %13 : vector<152x128xf32>
    %cst_10 = arith.constant dense<0xFF800000> : vector<152xf32>
    %15 = vector.multi_reduction <maximumf>, %14, %cst_10 [1] : vector<152x128xf32> to vector<152xf32>
    %16 = vector.shape_cast %15 : vector<152xf32> to vector<152x1xf32>
    %17 = vector.broadcast %16 : vector<152x1xf32> to vector<152x128xf32>
    %18 = arith.subf %14, %17 : vector<152x128xf32>
    %19 = math.exp %18 : vector<152x128xf32>
    %cst_11 = arith.constant dense<0.000000e+00> : vector<152xf32>
    %20 = vector.multi_reduction <add>, %19, %cst_11 [1] : vector<152x128xf32> to vector<152xf32>
    %21 = vector.shape_cast %20 : vector<152xf32> to vector<152x1xf32>
    %22 = vector.broadcast %21 : vector<152x1xf32> to vector<152x128xf32>
    %23 = arith.divf %19, %22 : vector<152x128xf32>
    %24 = vector.extract_strided_slice %23 {offsets = [0, 0], sizes = [152, 8], strides = [1, 1]} : vector<152x128xf32> to vector<152x8xf32>
    %c0_12 = arith.constant 0 : index
    %c0_13 = arith.constant 0 : index
    %25 = vector.load %arg6[%c0_12, %c0_13] : memref<152x8xf32, #tpu.memory_space<vmem>>, vector<152x8xf32>
    tpu.vector_store %arg6[%c0_12, %c0_13], %24 {strides = array<i32>} : memref<152x8xf32, #tpu.memory_space<vmem>>, vector<152x8xf32>,
    return
  }
  func.func @transform_0(%arg0: i32) -> (i32, i32) {
    %c0_i32 = arith.constant 0 : i32
    %c0_i32_0 = arith.constant 0 : i32
    return %arg0, %c0_i32 : i32, i32
  }
  func.func @transform_1(%arg0: i32) -> (i32, i32) {
    %c0_i32 = arith.constant 0 : i32
    %c0_i32_0 = arith.constant 0 : i32
    %c0_i32_1 = arith.constant 0 : i32
    return %c0_i32, %c0_i32_0 : i32, i32
  }
  func.func @transform_2(%arg0: i32) -> (i32, i32) {
    %c0_i32 = arith.constant 0 : i32
    %c0_i32_0 = arith.constant 0 : i32
    %c0_i32_1 = arith.constant 0 : i32
    return %c0_i32, %c0_i32_0 : i32, i32
  }
  func.func @transform_3(%arg0: i32) -> (i32, i32) {
    %c0_i32 = arith.constant 0 : i32
    %c0_i32_0 = arith.constant 0 : i32
    %c0_i32_1 = arith.constant 0 : i32
    return %c0_i32, %c0_i32_0 : i32, i32
  }
  func.func @transform_4(%arg0: i32) -> (i32, i32) {
    %c0_i32 = arith.constant 0 : i32
    %c0_i32_0 = arith.constant 0 : i32
    %c0_i32_1 = arith.constant 0 : i32
    return %c0_i32, %c0_i32_0 : i32, i32
  }
  func.func @transform_5(%arg0: i32) -> (i32, i32) {
    %c0_i32 = arith.constant 0 : i32
    %c0_i32_0 = arith.constant 0 : i32
    return %arg0, %c0_i32 : i32, i32
  }
}

</mosaic_0001>

<bundles_post_ra>
// kernel: gnet_forward.1
= control target key start
LH: loop header
LB: loop body
LE: loop exit
PB: predicated region body
PF: predicated region fallthrough
CT: control target
= control target key end

     0   :  { %s1141_s18 = smov 0   ;;  %s1568_s0 = inlined_call_operand.vmem [shape: f32[304,1], index: 0, kind: input, shape index: {}]   ;;  %s1569_s1 = inlined_call_operand.vmem [shape: f32[1,128], index: 1, kind: input, shape index: {}]   ;;  %s1570_s2 = inlined_call_operand.vmem [shape: f32[1,128], index: 2, kind: input, shape index: {}]   ;;  %s1571_s3 = inlined_call_operand.vmem [shape: f32[128,128], index: 3, kind: input, shape index: {}]   ;;  %s1572_s4 = inlined_call_operand.vmem [shape: f32[1,128], index: 4, kind: input, shape index: {}]   ;;  %s1573_s5 = inlined_call_operand.vmem [shape: f32[304,8], index: 5, kind: output, shape index: {}]  }
   0x1 LB: > { %s843_s19 = sadd.s32 4294967295, %s1106_s18   ;;  %p847_p0 = scmp.ge.s32.totalorder %s1106_s18, 1  ;;  %s1106_s18 = sphi %s1141_s18, %s15_s18  }
   0x2   : > { %p188_p1 = scmp.lt.s32.totalorder %s1106_s18, 3 }
   0x4   : > { %p189_p2 = pnand %p847_p0, %p188_p1 }
   0x5   : > { %s216_s20 = smul.u32 (!%p189_p2), 19, %s843_s19 }
   0x6   : > { %192 = sbr.rel (%p189_p2) target bundleno = 696 (0x2b8), region = 40 }
   0x7   : > { %p217_p3 = scmp.lt.s32.totalorder (!%p189_p2), %s216_s20, 37 }
   0xb   : > { %v428_v0 = vld [vmem:[%s1571_s3 + $0x78] sm:$0xff]  ;;  %v1108_v1 = vmov 0   ;;  %v1109_v2 = vmov 0.0   ;;  %v427_v3 = vld [vmem:[%s1571_s3 + $0x70] sm:$0xff]  ;;  %s1575_s20 = smov (!%p217_p3, %s216_s20), 37  ;;  %v426_v4 = vld [vmem:[%s1571_s3 + $0x68] sm:$0xff] }
   0xc   : > { %1023 = vset.pattern.permute.xlu1 %v1108_v1  ;;  %1022 = vset.pattern.permute.xlu0 %v1108_v1  ;;  %s848_s27 = sshll.u32 %s1575_s20, 3  ;;  %v425_v5 = vld [vmem:[%s1571_s3 + $0x60] sm:$0xff]  ;;  %v424_v8 = vld [vmem:[%s1571_s3 + $0x58] sm:$0xff]  ;;  %v423_v11 = vld [vmem:[%s1571_s3 + $0x50] sm:$0xff]  ;;  %vm1110_vm0 = vmmov 0   ;;  %vm767_vm1 = vcmask 64512  }
   0xd   : > { %890 = vmatprep.subr.mxu0 %v1109_v2  ;;  %979 = vmatprep.subr.mxu1 %v1109_v2  ;;  %s1172_s30 = scalar_lea.vmem %s1568_s0, %s848_s27  ;;  %v422_v14 = vld [vmem:[%s1571_s3 + $0x48] sm:$0xff]  ;;  %v421_v15 = vld [vmem:[%s1571_s3 + $0x40] sm:$0xff]  ;;  %v420_v18 = vld [vmem:[%s1571_s3 + $0x38] sm:$0xff]  ;;  %s1506_s19 = scalar_lea.vmem %s1573_s5, %s848_s27 }
   0xe   : > { %891 = vmatpush3.msra.mxu0 %v428_v0  ;;  %995 = vmatpush3.msra.mxu1 %v428_v0  ;;  %v238_v6 = vld [vmem:[%s1172_s30 + $0x50] sm:$0xff]  ;;  %v228_v7 = vld [vmem:[%s1172_s30] sm:$0xff]  ;;  %v229_v10 = vld [vmem:[%s1172_s30 + $0x8] sm:$0xff] }
   0xf   : > { %892 = vmatprep.subr.mxu0 %v1109_v2  ;;  %980 = vmatprep.subr.mxu1 %v1109_v2  ;;  %v230_v9 = vld [vmem:[%s1172_s30 + $0x10] sm:$0xff]  ;;  %v231_v12 = vld [vmem:[%s1172_s30 + $0x18] sm:$0xff]  ;;  %v232_v16 = vld [vmem:[%s1172_s30 + $0x20] sm:$0xff] }
  0x10   : > { %893 = vmatpush3.msra.mxu0 %v427_v3  ;;  %996 = vmatpush3.msra.mxu1 %v427_v3  ;;  %v239_v13 = vld [vmem:[%s1172_s30 + $0x58] sm:$0xff]  ;;  %v240_v17 = vld [vmem:[%s1172_s30 + $0x60] sm:$0xff]  ;;  %v233_v19 = vld [vmem:[%s1172_s30 + $0x28] sm:$0xff] }
  0x11   : > { %894 = vmatprep.subr.mxu0 %v1109_v2  ;;  %981 = vmatprep.subr.mxu1 %v1109_v2  ;;  %v241_v20 = vld [vmem:[%s1172_s30 + $0x68] sm:$0xff]  ;;  %v419_v21 = vld [vmem:[%s1571_s3 + $0x30] sm:$0xff]  ;;  %v417_v25 = vld [vmem:[%s1571_s3 + $0x20] sm:$0xff] }
  0x12   : > { %895 = vmatpush3.msra.mxu0 %v426_v4  ;;  %997 = vmatpush3.msra.mxu1 %v426_v4  ;;  %v418_v22 = vld [vmem:[%s1571_s3 + $0x28] sm:$0xff]  ;;  %v234_v23 = vld [vmem:[%s1172_s30 + $0x30] sm:$0xff]  ;;  %v235_v26 = vld [vmem:[%s1172_s30 + $0x38] sm:$0xff] }
  0x13   : > { %896 = vmatprep.subr.mxu0 %v1109_v2  ;;  %982 = vmatprep.subr.mxu1 %v1109_v2  ;;  %v242_v24 = vld [vmem:[%s1172_s30 + $0x70] sm:$0xff]  ;;  %v243_v27 = vld [vmem:[%s1172_s30 + $0x78] sm:$0xff]  ;;  %v236_v30 = vld [vmem:[%s1172_s30 + $0x40] sm:$0xff] }
  0x14   : > { %300 = vperm.xlu1 %1023, %v238_v6   ;;  %250 = vperm.xlu0 %1022, %v228_v7   ;;  %v416_v28 = vld [vmem:[%s1571_s3 + $0x18] sm:$0xff]  ;;  %v415_v29 = vld [vmem:[%s1571_s3 + $0x10] sm:$0xff]  ;;  %v244_v31 = vld [vmem:[%s1172_s30 + $0x80] sm:$0xff] }
  0x15   : > { %897 = vmatpush3.msra.mxu0 %v425_v5  ;;  %998 = vmatpush3.msra.mxu1 %v425_v5  ;;  %v414_v32 = vld [vmem:[%s1571_s3 + $0x8] sm:$0xff]  ;;  %v413_v35 = vld [vmem:[%s1571_s3] sm:$0xff]  ;;  %v246_v36 = vld [vmem:[%s1172_s30 + $0x90] sm:$0xff] }
  0x16   : > { %898 = vmatprep.subr.mxu0 %v1109_v2  ;;  %983 = vmatprep.subr.mxu1 %v1109_v2  ;;  %v237_v33 = vld [vmem:[%s1172_s30 + $0x48] sm:$0xff]  ;;  %v1265_v37 = vld [vmem:[%s1569_s1] ss:$0 sm:$0xff] }
  0x17   : > { %899 = vmatpush3.msra.mxu0 %v424_v8  ;;  %999 = vmatpush3.msra.mxu1 %v424_v8  ;;  %v245_v34 = vld [vmem:[%s1172_s30 + $0x88] sm:$0xff]  ;;  %v1270_v38 = vld [vmem:[%s1570_s2] ss:$0 sm:$0xff] }
  0x18   : > { %260 = vperm.xlu1 %1023, %v230_v9   ;;  %255 = vperm.xlu0 %1022, %v229_v10  }
  0x19   : > { %900 = vmatprep.subr.mxu0 %v1109_v2  ;;  %984 = vmatprep.subr.mxu1 %v1109_v2 }
  0x1a   : > { %901 = vmatpush3.msra.mxu0 %v423_v11  ;;  %1000 = vmatpush3.msra.mxu1 %v423_v11 }
  0x1b   : > { %902 = vmatprep.subr.mxu0 %v1109_v2  ;;  %985 = vmatprep.subr.mxu1 %v1109_v2 }
  0x1c   : > { %265 = vperm.xlu1 %1023, %v231_v12   ;;  %305 = vperm.xlu0 %1022, %v239_v13  }
  0x1d   : > { %903 = vmatpush3.msra.mxu0 %v422_v14  ;;  %1001 = vmatpush3.msra.mxu1 %v422_v14 }
  0x1e   : > { %904 = vmatprep.subr.mxu0 %v1109_v2  ;;  %986 = vmatprep.subr.mxu1 %v1109_v2 }
  0x1f   : > { %905 = vmatpush3.msra.mxu0 %v421_v15  ;;  %1002 = vmatpush3.msra.mxu1 %v421_v15 }
  0x20   : > { %270 = vperm.xlu1 %1023, %v232_v16   ;;  %310 = vperm.xlu0 %1022, %v240_v17  }
  0x21   : > { %906 = vmatprep.subr.mxu0 %v1109_v2  ;;  %987 = vmatprep.subr.mxu1 %v1109_v2 }
  0x22   : > { %907 = vmatpush3.msra.mxu0 %v420_v18  ;;  %1003 = vmatpush3.msra.mxu1 %v420_v18 }
  0x23   : > { %908 = vmatprep.subr.mxu0 %v1109_v2  ;;  %988 = vmatprep.subr.mxu1 %v1109_v2 }
  0x24   : > { %275 = vperm.xlu1 %1023, %v233_v19   ;;  %315 = vperm.xlu0 %1022, %v241_v20  }
  0x25   : > { %909 = vmatpush3.msra.mxu0 %v419_v21  ;;  %1004 = vmatpush3.msra.mxu1 %v419_v21 }
  0x26   : > { %910 = vmatprep.subr.mxu0 %v1109_v2  ;;  %989 = vmatprep.subr.mxu1 %v1109_v2 }
  0x27   : > { %911 = vmatpush3.msra.mxu0 %v418_v22  ;;  %1005 = vmatpush3.msra.mxu1 %v418_v22 }
  0x28   : > { %280 = vperm.xlu1 %1023, %v234_v23   ;;  %320 = vperm.xlu0 %1022, %v242_v24  }
  0x29   : > { %912 = vmatprep.subr.mxu0 %v1109_v2  ;;  %990 = vmatprep.subr.mxu1 %v1109_v2 }
  0x2a   : > { %913 = vmatpush3.msra.mxu0 %v417_v25  ;;  %1006 = vmatpush3.msra.mxu1 %v417_v25 }
  0x2b   : > { %914 = vmatprep.subr.mxu0 %v1109_v2  ;;  %991 = vmatprep.subr.mxu1 %v1109_v2 }
  0x2c   : > { %285 = vperm.xlu1 %1023, %v235_v26   ;;  %325 = vperm.xlu0 %1022, %v243_v27  }
  0x2d   : > { %915 = vmatpush3.msra.mxu0 %v416_v28  ;;  %1007 = vmatpush3.msra.mxu1 %v416_v28 }
  0x2e   : > { %916 = vmatprep.subr.mxu0 %v1109_v2  ;;  %992 = vmatprep.subr.mxu1 %v1109_v2 }
  0x2f   : > { %917 = vmatpush3.msra.mxu0 %v415_v29  ;;  %1008 = vmatpush3.msra.mxu1 %v415_v29 }
  0x30   : > { %290 = vperm.xlu1 %1023, %v236_v30   ;;  %330 = vperm.xlu0 %1022, %v244_v31  }
  0x31   : > { %918 = vmatprep.subr.mxu0 %v1109_v2  ;;  %993 = vmatprep.subr.mxu1 %v1109_v2 }
  0x32   : > { %919 = vmatpush3.msra.mxu0 %v414_v32  ;;  %1009 = vmatpush3.msra.mxu1 %v414_v32 }
  0x33   : > { %920 = vmatprep.subr.mxu0 %v1109_v2  ;;  %994 = vmatprep.subr.mxu1 %v1109_v2 }
  0x34   : > { %295 = vperm.xlu1 %1023, %v237_v33   ;;  %335 = vperm.xlu0 %1022, %v245_v34  }
  0x35   : > { %921 = vmatpush3.msra.mxu0 %v413_v35  ;;  %1010 = vmatpush3.msra.mxu1 %v413_v35 }
  0x36   : > { %922 = vmatprep.mubr.msk.f32.mxu0 %vm1110_vm0, %v1109_v2  ;;  %952 = vmatprep.mubr.msk.f32.mxu1 %vm1110_vm0, %v1109_v2 }
  0x38   : > { %340 = vperm.xlu0 %1022, %v246_v36  }
  0x8f   : > { %v301_v39 = vpop.permute.xlu1 %300  ;;  %v251_v40 = vpop.permute.xlu0 %250 }
  0x90   : > { %v359_v41 = vmul.f32 %v1265_v37, %v301_v39  ;;  %v349_v42 = vmul.f32 %v1265_v37, %v251_v40 }
  0x92   : > { %v385_v43 = vadd.f32 %v1270_v38, %v359_v41  ;;  %v375_v44 = vadd.f32 %v1270_v38, %v349_v42 }
  0x93   : > { %v261_v45 = vpop.permute.xlu1 %260  ;;  %v256_v46 = vpop.permute.xlu0 %255 }
  0x94   : > { %v404_v47 = vmax.f32 %v385_v43, 0.0  ;;  %v394_v48 = vmax.f32 %v375_v44, 0.0  ;;  %v351_v49 = vmul.f32 %v1265_v37, %v261_v45  ;;  %v350_v50 = vmul.f32 %v1265_v37, %v256_v46 }
  0x96   : > { %v376_v51 = vadd.f32 %v1270_v38, %v350_v50  ;;  %923 = vmatmul.mubr.f32.vlgmr.msra.gmra.mxu0 %v394_v48  ;;  %953 = vmatmul.mubr.f32.vlgmr.msra.gmra.mxu1 %v404_v47  ;;  %v377_v54 = vadd.f32 %v1270_v38, %v351_v49 }
  0x97   : > { %v266_v52 = vpop.permute.xlu1 %265  ;;  %v306_v53 = vpop.permute.xlu0 %305  ;;  %925 = vmatprep.mubr.msk.f32.mxu0 %vm1110_vm0, %v1109_v2  ;;  %955 = vmatprep.mubr.msk.f32.mxu1 %vm1110_vm0, %v1109_v2 }
  0x98   : > { %v395_v55 = vmax.f32 %v376_v51, 0.0  ;;  %v352_v56 = vmul.f32 %v1265_v37, %v266_v52  ;;  %v360_v57 = vmul.f32 %v1265_v37, %v306_v53  ;;  %v396_v62 = vmax.f32 %v377_v54, 0.0  ;;  %v1347_v54 = vld [vmem:[%s1572_s4] ss:$0 sm:$0xff] }
  0x9a   : > { %v386_v58 = vadd.f32 %v1270_v38, %v360_v57  ;;  %926 = vmatmul.mubr.f32.gmra.mxu0 %v395_v55  ;;  %v378_v59 = vadd.f32 %v1270_v38, %v352_v56 }
  0x9b   : > { %v271_v60 = vpop.permute.xlu1 %270  ;;  %v311_v61 = vpop.permute.xlu0 %310  ;;  %928 = vmatprep.mubr.msk.f32.mxu0 %vm1110_vm0, %v1109_v2 }
  0x9c   : > { %v405_v63 = vmax.f32 %v386_v58, 0.0  ;;  %v353_v0 = vmul.f32 %v1265_v37, %v271_v60  ;;  %v361_v1 = vmul.f32 %v1265_v37, %v311_v61  ;;  %v397_v4 = vmax.f32 %v378_v59, 0.0 }
  0x9e   : > { %v387_v3 = vadd.f32 %v1270_v38, %v361_v1  ;;  %929 = vmatmul.mubr.f32.gmra.mxu0 %v396_v62  ;;  %956 = vmatmul.mubr.f32.gmra.mxu1 %v405_v63  ;;  %v379_v7 = vadd.f32 %v1270_v38, %v353_v0 }
  0x9f   : > { %v276_v5 = vpop.permute.xlu1 %275  ;;  %v316_v6 = vpop.permute.xlu0 %315  ;;  %931 = vmatprep.mubr.msk.f32.mxu0 %vm1110_vm0, %v1109_v2  ;;  %958 = vmatprep.mubr.msk.f32.mxu1 %vm1110_vm0, %v1109_v2 }
  0xa0   : > { %v406_v8 = vmax.f32 %v387_v3, 0.0  ;;  %v354_v9 = vmul.f32 %v1265_v37, %v276_v5  ;;  %v362_v10 = vmul.f32 %v1265_v37, %v316_v6  ;;  %v398_v15 = vmax.f32 %v379_v7, 0.0 }
  0xa2   : > { %v388_v11 = vadd.f32 %v1270_v38, %v362_v10  ;;  %932 = vmatmul.mubr.f32.gmra.mxu0 %v397_v4  ;;  %959 = vmatmul.mubr.f32.gmra.mxu1 %v406_v8  ;;  %v380_v12 = vadd.f32 %v1270_v38, %v354_v9 }
  0xa3   : > { %v281_v13 = vpop.permute.xlu1 %280  ;;  %v321_v14 = vpop.permute.xlu0 %320  ;;  %934 = vmatprep.mubr.msk.f32.mxu0 %vm1110_vm0, %v1109_v2  ;;  %961 = vmatprep.mubr.msk.f32.mxu1 %vm1110_vm0, %v1109_v2 }
  0xa4   : > { %v407_v16 = vmax.f32 %v388_v11, 0.0  ;;  %v355_v17 = vmul.f32 %v1265_v37, %v281_v13  ;;  %v363_v18 = vmul.f32 %v1265_v37, %v321_v14  ;;  %v399_v20 = vmax.f32 %v380_v12, 0.0 }
  0xa6   : > { %v389_v19 = vadd.f32 %v1270_v38, %v363_v18  ;;  %935 = vmatmul.mubr.f32.gmra.mxu0 %v398_v15  ;;  %962 = vmatmul.mubr.f32.gmra.mxu1 %v407_v16  ;;  %v381_v23 = vadd.f32 %v1270_v38, %v355_v17 }
  0xa7   : > { %v286_v21 = vpop.permute.xlu1 %285  ;;  %v326_v22 = vpop.permute.xlu0 %325  ;;  %937 = vmatprep.mubr.msk.f32.mxu0 %vm1110_vm0, %v1109_v2  ;;  %964 = vmatprep.mubr.msk.f32.mxu1 %vm1110_vm0, %v1109_v2 }
  0xa8   : > { %v408_v24 = vmax.f32 %v389_v19, 0.0  ;;  %v356_v25 = vmul.f32 %v1265_v37, %v286_v21  ;;  %v364_v26 = vmul.f32 %v1265_v37, %v326_v22  ;;  %v400_v31 = vmax.f32 %v381_v23, 0.0 }
  0xaa   : > { %v390_v27 = vadd.f32 %v1270_v38, %v364_v26  ;;  %938 = vmatmul.mubr.f32.gmra.mxu0 %v399_v20  ;;  %965 = vmatmul.mubr.f32.gmra.mxu1 %v408_v24  ;;  %v382_v28 = vadd.f32 %v1270_v38, %v356_v25 }
  0xab   : > { %v291_v29 = vpop.permute.xlu1 %290  ;;  %v331_v30 = vpop.permute.xlu0 %330  ;;  %940 = vmatprep.mubr.msk.f32.mxu0 %vm1110_vm0, %v1109_v2  ;;  %967 = vmatprep.mubr.msk.f32.mxu1 %vm1110_vm0, %v1109_v2 }
  0xac   : > { %v409_v32 = vmax.f32 %v390_v27, 0.0  ;;  %v357_v33 = vmul.f32 %v1265_v37, %v291_v29  ;;  %v365_v34 = vmul.f32 %v1265_v37, %v331_v30  ;;  %v401_v36 = vmax.f32 %v382_v28, 0.0 }
  0xae   : > { %v391_v35 = vadd.f32 %v1270_v38, %v365_v34  ;;  %941 = vmatmul.mubr.f32.gmra.mxu0 %v400_v31  ;;  %968 = vmatmul.mubr.f32.gmra.mxu1 %v409_v32  ;;  %v383_v41 = vadd.f32 %v1270_v38, %v357_v33 }
  0xaf   : > { %v296_v39 = vpop.permute.xlu1 %295  ;;  %v336_v40 = vpop.permute.xlu0 %335  ;;  %943 = vmatprep.mubr.msk.f32.mxu0 %vm1110_vm0, %v1109_v2  ;;  %970 = vmatprep.mubr.msk.f32.mxu1 %vm1110_vm0, %v1109_v2 }
  0xb0   : > { %v410_v42 = vmax.f32 %v391_v35, 0.0  ;;  %v358_v43 = vmul.f32 %v1265_v37, %v296_v39  ;;  %v366_v44 = vmul.f32 %v1265_v37, %v336_v40  ;;  %v402_v47 = vmax.f32 %v383_v41, 0.0 }
  0xb2   : > { %v392_v45 = vadd.f32 %v1270_v38, %v366_v44  ;;  %944 = vmatmul.mubr.f32.gmra.mxu0 %v401_v36  ;;  %971 = vmatmul.mubr.f32.gmra.mxu1 %v410_v42  ;;  %v384_v48 = vadd.f32 %v1270_v38, %v358_v43 }
  0xb3   : > { %v341_v46 = vpop.permute.xlu0 %340  ;;  %946 = vmatprep.mubr.msk.f32.mxu0 %vm1110_vm0, %v1109_v2  ;;  %973 = vmatprep.mubr.msk.f32.mxu1 %vm1110_vm0, %v1109_v2 }
  0xb4   : > { %v411_v49 = vmax.f32 %v392_v45, 0.0  ;;  %v367_v50 = vmul.f32 %v1265_v37, %v341_v46  ;;  %v403_v52 = vmax.f32 %v384_v48, 0.0 }
  0xb6   : > { %v393_v51 = vadd.f32 %v1270_v38, %v367_v50  ;;  %947 = vmatmul.mubr.f32.gmra.mxu0 %v402_v47  ;;  %974 = vmatmul.mubr.f32.gmra.mxu1 %v411_v49 }
  0xb7   : > { %949 = vmatprep.mubr.msk.f32.mxu0 %vm1110_vm0, %v1109_v2  ;;  %976 = vmatprep.mubr.msk.f32.mxu1 %vm1110_vm0, %v1109_v2 }
  0xb8   : > { %v412_v53 = vmax.f32 %v393_v51, 0.0 }
  0xba   : > { %950 = vmatmul.mubr.f32.gmra.mxu0 %v403_v52  ;;  %977 = vmatmul.mubr.f32.gmra.mxu1 %v412_v53 }
 0x156   : > { %v502_v37 = vpop.f32.mrf.mxu0  ;;  %v552_v55 = vpop.f32.mrf.mxu1 }
 0x157   : > { %v1350_v38 = vadd.f32 %v1347_v54, %v502_v37  ;;  %v1353_v56 = vadd.f32 %v1347_v54, %v552_v55 }
 0x158   : > { %v924_v57 = vpop.f32.mrf.mxu0  ;;  %v954_v58 = vpop.f32.mrf.mxu1 }
 0x159   : > { %616 = vmax.xlane.f32.xlu0 %v1353_v56  ;;  %596 = vmax.xlane.f32.xlu1 %v1350_v38 }
 0x15a   : > { %v507_v2 = vpop.f32.mrf.mxu0 }
 0x15b   : > { %v1358_v59 = vadd.f32 %v1347_v54, %v507_v2 }
 0x15c   : > { %v927_v60 = vpop.f32.mrf.mxu0 }
 0x15d   : > { %598 = vmax.xlane.f32.xlu0 %v1358_v59 }
 0x15e   : > { %v512_v61 = vpop.f32.mrf.mxu0  ;;  %v557_v62 = vpop.f32.mrf.mxu1 }
 0x15f   : > { %v1362_v63 = vadd.f32 %v1347_v54, %v512_v61  ;;  %v1365_v0 = vadd.f32 %v1347_v54, %v557_v62 }
 0x160   : > { %v930_v1 = vpop.f32.mrf.mxu0  ;;  %v957_v3 = vpop.f32.mrf.mxu1 }
 0x161   : > { %600 = vmax.xlane.f32.xlu0 %v1362_v63  ;;  %618 = vmax.xlane.f32.xlu1 %v1365_v0 }
 0x162   : > { %v517_v4 = vpop.f32.mrf.mxu0  ;;  %v562_v5 = vpop.f32.mrf.mxu1 }
 0x163   : > { %v1370_v6 = vadd.f32 %v1347_v54, %v517_v4  ;;  %v1373_v7 = vadd.f32 %v1347_v54, %v562_v5 }
 0x164   : > { %v933_v8 = vpop.f32.mrf.mxu0  ;;  %v960_v9 = vpop.f32.mrf.mxu1 }
 0x165   : > { %602 = vmax.xlane.f32.xlu1 %v1370_v6  ;;  %620 = vmax.xlane.f32.xlu0 %v1373_v7 }
 0x166   : > { %v522_v10 = vpop.f32.mrf.mxu0  ;;  %v567_v11 = vpop.f32.mrf.mxu1 }
 0x167   : > { %v1378_v12 = vadd.f32 %v1347_v54, %v522_v10  ;;  %v1381_v13 = vadd.f32 %v1347_v54, %v567_v11 }
 0x168   : > { %v936_v14 = vpop.f32.mrf.mxu0  ;;  %v963_v15 = vpop.f32.mrf.mxu1 }
 0x169   : > { %604 = vmax.xlane.f32.xlu0 %v1378_v12  ;;  %622 = vmax.xlane.f32.xlu1 %v1381_v13 }
 0x16a   : > { %v527_v16 = vpop.f32.mrf.mxu0  ;;  %v572_v17 = vpop.f32.mrf.mxu1 }
 0x16b   : > { %v1386_v18 = vadd.f32 %v1347_v54, %v527_v16  ;;  %v1389_v19 = vadd.f32 %v1347_v54, %v572_v17 }
 0x16c   : > { %v939_v20 = vpop.f32.mrf.mxu0  ;;  %v966_v21 = vpop.f32.mrf.mxu1 }
 0x16d   : > { %606 = vmax.xlane.f32.xlu1 %v1386_v18  ;;  %624 = vmax.xlane.f32.xlu0 %v1389_v19 }
 0x16e   : > { %v532_v22 = vpop.f32.mrf.mxu0  ;;  %v577_v23 = vpop.f32.mrf.mxu1 }
 0x16f   : > { %v1394_v24 = vadd.f32 %v1347_v54, %v532_v22  ;;  %v1397_v25 = vadd.f32 %v1347_v54, %v577_v23 }
 0x170   : > { %v942_v26 = vpop.f32.mrf.mxu0  ;;  %v969_v27 = vpop.f32.mrf.mxu1 }
 0x171   : > { %608 = vmax.xlane.f32.xlu0 %v1394_v24  ;;  %626 = vmax.xlane.f32.xlu1 %v1397_v25 }
 0x172   : > { %v537_v28 = vpop.f32.mrf.mxu0  ;;  %v582_v29 = vpop.f32.mrf.mxu1 }
 0x173   : > { %v1402_v30 = vadd.f32 %v1347_v54, %v537_v28  ;;  %v1405_v31 = vadd.f32 %v1347_v54, %v582_v29 }
 0x174   : > { %v945_v32 = vpop.f32.mrf.mxu0  ;;  %v972_v33 = vpop.f32.mrf.mxu1 }
 0x175   : > { %610 = vmax.xlane.f32.xlu1 %v1402_v30  ;;  %628 = vmax.xlane.f32.xlu0 %v1405_v31 }
 0x176   : > { %v542_v34 = vpop.f32.mrf.mxu0  ;;  %v587_v35 = vpop.f32.mrf.mxu1 }
 0x177   : > { %v1410_v36 = vadd.f32 %v1347_v54, %v542_v34  ;;  %v1422_v47 = vadd.f32 %v1347_v54, %v587_v35 }
 0x178   : > { %v948_v39 = vpop.f32.mrf.mxu0  ;;  %v975_v40 = vpop.f32.mrf.mxu1 }
 0x179   : > { %612 = vmax.xlane.f32.xlu0 %v1410_v36 }
 0x17a   : > { %v547_v41 = vpop.f32.mrf.mxu0  ;;  %v592_v42 = vpop.f32.mrf.mxu1 }
 0x17b   : > { %v1414_v43 = vadd.f32 %v1347_v54, %v547_v41  ;;  %v1417_v44 = vadd.f32 %v1347_v54, %v592_v42 }
 0x17c   : > { %v951_v45 = vpop.f32.mrf.mxu0  ;;  %v978_v46 = vpop.f32.mrf.mxu1 }
 0x17d   : > { %614 = vmax.xlane.f32.xlu1 %v1414_v43  ;;  %632 = vmax.xlane.f32.xlu0 %v1417_v44 }
 0x181   : > { %630 = vmax.xlane.f32.xlu1 %v1422_v47 }
 0x1e2   : > { %v597_v48 = vpop.xlane.xlu1 %596  ;;  %v617_v49 = vpop.xlane.xlu0 %616 }
 0x1e3   : > { %v634_v50 = vsub.f32 %v1350_v38, %v597_v48  ;;  %v644_v51 = vsub.f32 %v1353_v56, %v617_v49 }
 0x1e5   : > { %v653_v52 = vmul.f32 1.442695, %v634_v50  ;;  %v673_v53 = vmul.f32 1.442695, %v644_v51 }
 0x1e6   : > { %v599_v37 = vpop.xlane.xlu0 %598 }
 0x1e7   : > { %1024 = vpow2.f32 %v653_v52  ;;  %v635_v55 = vsub.f32 %v1358_v59, %v599_v37 }
 0x1e8   : > { %1026 = vpow2.f32 %v673_v53 }
 0x1e9   : > { %v655_v57 = vmul.f32 1.442695, %v635_v55 }
 0x1ea   : > { %v619_v58 = vpop.xlane.xlu1 %618  ;;  %v601_v2 = vpop.xlane.xlu0 %600 }
 0x1eb   : > { %1028 = vpow2.f32 %v655_v57  ;;  %v645_v54 = vsub.f32 %v1365_v0, %v619_v58  ;;  %v636_v60 = vsub.f32 %v1362_v63, %v601_v2 }
 0x1ed   : > { %v675_v61 = vmul.f32 1.442695, %v645_v54  ;;  %v657_v62 = vmul.f32 1.442695, %v636_v60 }
 0x1ee   : > { %v603_v38 = vpop.xlane.xlu1 %602  ;;  %v621_v1 = vpop.xlane.xlu0 %620 }
 0x1ef   : > { %1030 = vpow2.f32 %v675_v61  ;;  %v637_v56 = vsub.f32 %v1370_v6, %v603_v38  ;;  %v646_v3 = vsub.f32 %v1373_v7, %v621_v1 }
 0x1f0   : > { %1032 = vpow2.f32 %v657_v62 }
 0x1f1   : > { %v659_v59 = vmul.f32 1.442695, %v637_v56  ;;  %v677_v4 = vmul.f32 1.442695, %v646_v3 }
 0x1f2   : > { %v623_v5 = vpop.xlane.xlu1 %622  ;;  %v605_v8 = vpop.xlane.xlu0 %604 }
 0x1f3   : > { %1034 = vpow2.f32 %v659_v59  ;;  %v647_v9 = vsub.f32 %v1381_v13, %v623_v5  ;;  %v638_v0 = vsub.f32 %v1378_v12, %v605_v8 }
 0x1f4   : > { %v1434_v63 = vpop.eup %1024  ;;  %1036 = vpow2.f32 %v677_v4 }
 0x1f5   : > { %v679_v10 = vmul.f32 1.442695, %v647_v9  ;;  %v661_v11 = vmul.f32 1.442695, %v638_v0  ;;  %691 = vadd.xlane.f32.xlu1 %v1434_v63  ;;  %v1437_v7 = vpop.eup %1026 }
 0x1f6   : > { %v607_v6 = vpop.xlane.xlu1 %606  ;;  %v625_v14 = vpop.xlane.xlu0 %624 }
 0x1f7   : > { %1038 = vpow2.f32 %v679_v10  ;;  %v639_v15 = vsub.f32 %v1386_v18, %v607_v6  ;;  %v648_v16 = vsub.f32 %v1389_v19, %v625_v14 }
 0x1f8   : > { %v1441_v17 = vpop.eup %1028  ;;  %1040 = vpow2.f32 %v661_v11 }
 0x1f9   : > { %v663_v12 = vmul.f32 1.442695, %v639_v15  ;;  %v681_v13 = vmul.f32 1.442695, %v648_v16  ;;  %711 = vadd.xlane.f32.xlu1 %v1437_v7  ;;  %693 = vadd.xlane.f32.xlu0 %v1441_v17 }
 0x1fa   : > { %v627_v20 = vpop.xlane.xlu1 %626  ;;  %v609_v21 = vpop.xlane.xlu0 %608 }
 0x1fb   : > { %1042 = vpow2.f32 %v663_v12  ;;  %v649_v22 = vsub.f32 %v1397_v25, %v627_v20  ;;  %v640_v23 = vsub.f32 %v1394_v24, %v609_v21 }
 0x1fc   : > { %v1447_v26 = vpop.eup %1030  ;;  %1044 = vpow2.f32 %v681_v13 }
 0x1fd   : > { %v1449_v18 = vpop.eup %1032  ;;  %v683_v19 = vmul.f32 1.442695, %v649_v22  ;;  %v665_v27 = vmul.f32 1.442695, %v640_v23  ;;  %713 = vadd.xlane.f32.xlu0 %v1447_v26 }
 0x1fe   : > { %695 = vadd.xlane.f32.xlu1 %v1449_v18  ;;  %v611_v28 = vpop.xlane.xlu1 %610  ;;  %v629_v29 = vpop.xlane.xlu0 %628 }
 0x1ff   : > { %1046 = vpow2.f32 %v683_v19  ;;  %v641_v32 = vsub.f32 %v1402_v30, %v611_v28  ;;  %v650_v25 = vsub.f32 %v1405_v31, %v629_v29 }
 0x200   : > { %v1455_v33 = vpop.eup %1034  ;;  %1048 = vpow2.f32 %v665_v27 }
 0x201   : > { %v1457_v24 = vpop.eup %1036  ;;  %v667_v34 = vmul.f32 1.442695, %v641_v32  ;;  %v685_v35 = vmul.f32 1.442695, %v650_v25  ;;  %697 = vadd.xlane.f32.xlu0 %v1455_v33 }
 0x202   : > { %715 = vadd.xlane.f32.xlu1 %v1457_v24  ;;  %v613_v39 = vpop.xlane.xlu0 %612 }
 0x203   : > { %1050 = vpow2.f32 %v667_v34  ;;  %v642_v40 = vsub.f32 %v1410_v36, %v613_v39 }
 0x204   : > { %v1462_v41 = vpop.eup %1038  ;;  %1052 = vpow2.f32 %v685_v35 }
 0x205   : > { %v1464_v30 = vpop.eup %1040  ;;  %v669_v31 = vmul.f32 1.442695, %v642_v40  ;;  %717 = vadd.xlane.f32.xlu0 %v1462_v41 }
 0x206   : > { %699 = vadd.xlane.f32.xlu1 %v1464_v30  ;;  %v615_v42 = vpop.xlane.xlu1 %614  ;;  %v633_v45 = vpop.xlane.xlu0 %632 }
 0x207   : > { %1054 = vpow2.f32 %v669_v31  ;;  %v643_v46 = vsub.f32 %v1414_v43, %v615_v42  ;;  %v652_v48 = vsub.f32 %v1417_v44, %v633_v45 }
 0x208   : > { %v1470_v49 = vpop.eup %1042 }
 0x209   : > { %v1472_v36 = vpop.eup %1044  ;;  %v671_v50 = vmul.f32 1.442695, %v643_v46  ;;  %v689_v51 = vmul.f32 1.442695, %v652_v48  ;;  %701 = vadd.xlane.f32.xlu0 %v1470_v49 }
 0x20a   : > { %719 = vadd.xlane.f32.xlu1 %v1472_v36  ;;  %v631_v52 = vpop.xlane.xlu1 %630 }
 0x20b   : > { %1056 = vpow2.f32 %v671_v50  ;;  %v651_v53 = vsub.f32 %v1422_v47, %v631_v52 }
 0x20c   : > { %v1477_v37 = vpop.eup %1046  ;;  %1058 = vpow2.f32 %v689_v51 }
 0x20d   : > { %v1479_v43 = vpop.eup %1048  ;;  %v687_v44 = vmul.f32 1.442695, %v651_v53  ;;  %721 = vadd.xlane.f32.xlu0 %v1477_v37 }
 0x20e   : > { %703 = vadd.xlane.f32.xlu1 %v1479_v43 }
 0x20f   : > { %1060 = vpow2.f32 %v687_v44 }
 0x210   : > { %v1483_v55 = vpop.eup %1050 }
 0x211   : > { %v1485_v57 = vpop.eup %1052  ;;  %705 = vadd.xlane.f32.xlu0 %v1483_v55 }
 0x212   : > { %723 = vadd.xlane.f32.xlu1 %v1485_v57 }
 0x214   : > { %v1489_v47 = vpop.eup %1054 }
 0x216   : > { %707 = vadd.xlane.f32.xlu1 %v1489_v47 }
 0x218   : > { %v1492_v58 = vpop.eup %1056 }
 0x219   : > { %v1494_v2 = vpop.eup %1058  ;;  %709 = vadd.xlane.f32.xlu0 %v1492_v58 }
 0x21a   : > { %727 = vadd.xlane.f32.xlu1 %v1494_v2 }
 0x21c   : > { %v1498_v54 = vpop.eup %1060 }
 0x21d   : > { %725 = vadd.xlane.f32.xlu0 %v1498_v54 }
 0x27e   : > { %v692_v60 = vpop.xlane.xlu1 %691 }
 0x27f   : > { %1062 = vrcp.f32 %v692_v60 }
 0x282   : > { %v712_v61 = vpop.xlane.xlu1 %711  ;;  %v694_v62 = vpop.xlane.xlu0 %693 }
 0x283   : > { %1064 = vrcp.f32 %v712_v61 }
 0x284   : > { %1066 = vrcp.f32 %v694_v62 }
 0x286   : > { %v714_v38 = vpop.xlane.xlu0 %713 }
 0x287   : > { %v696_v1 = vpop.xlane.xlu1 %695  ;;  %1068 = vrcp.f32 %v714_v38 }
 0x288   : > { %1070 = vrcp.f32 %v696_v1 }
 0x28a   : > { %v698_v56 = vpop.xlane.xlu0 %697 }
 0x28b   : > { %v716_v3 = vpop.xlane.xlu1 %715  ;;  %1072 = vrcp.f32 %v698_v56 }
 0x28c   : > { %v1063_v59 = vpop.eup %1062  ;;  %1074 = vrcp.f32 %v716_v3 }
 0x28d   : > { %v730_v4 = vmul.f32 %v1063_v59, %v1434_v63 }
 0x28e   : > { %v718_v5 = vpop.xlane.xlu0 %717 }
 0x28f   : > { %768 = vst.msk [vmem:[%s1506_s19] sm:$0xff] %vm767_vm1, %v730_v4  ;;  %v700_v8 = vpop.xlane.xlu1 %699  ;;  %1076 = vrcp.f32 %v718_v5 }
 0x290   : > { %v1065_v9 = vpop.eup %1064  ;;  %1078 = vrcp.f32 %v700_v8 }
 0x291   : > { %v1067_v0 = vpop.eup %1066  ;;  %v750_v10 = vmul.f32 %v1065_v9, %v1437_v7 }
 0x292   : > { %v732_v11 = vmul.f32 %v1067_v0, %v1441_v17  ;;  %v702_v6 = vpop.xlane.xlu0 %701 }
 0x293   : > { %778 = vst.msk [vmem:[%s1506_s19 + $0x50] sm:$0xff] %vm767_vm1, %v750_v10  ;;  %v720_v14 = vpop.xlane.xlu1 %719  ;;  %1080 = vrcp.f32 %v702_v6 }
 0x294   : > { %v1069_v63 = vpop.eup %1068  ;;  %769 = vst.msk [vmem:[%s1506_s19 + $0x8] sm:$0xff] %vm767_vm1, %v732_v11  ;;  %1082 = vrcp.f32 %v720_v14 }
 0x295   : > { %v1071_v15 = vpop.eup %1070  ;;  %v752_v16 = vmul.f32 %v1069_v63, %v1447_v26 }
 0x296   : > { %v734_v12 = vmul.f32 %v1071_v15, %v1449_v18  ;;  %v722_v7 = vpop.xlane.xlu0 %721 }
 0x297   : > { %779 = vst.msk [vmem:[%s1506_s19 + $0x58] sm:$0xff] %vm767_vm1, %v752_v16  ;;  %v704_v17 = vpop.xlane.xlu1 %703  ;;  %1084 = vrcp.f32 %v722_v7 }
 0x298   : > { %v1073_v13 = vpop.eup %1072  ;;  %770 = vst.msk [vmem:[%s1506_s19 + $0x10] sm:$0xff] %vm767_vm1, %v734_v12  ;;  %1086 = vrcp.f32 %v704_v17 }
 0x299   : > { %v1075_v20 = vpop.eup %1074  ;;  %v736_v21 = vmul.f32 %v1073_v13, %v1455_v33 }
 0x29a   : > { %v754_v22 = vmul.f32 %v1075_v20, %v1457_v24  ;;  %v706_v23 = vpop.xlane.xlu0 %705 }
 0x29b   : > { %771 = vst.msk [vmem:[%s1506_s19 + $0x18] sm:$0xff] %vm767_vm1, %v736_v21  ;;  %v724_v26 = vpop.xlane.xlu1 %723  ;;  %1088 = vrcp.f32 %v706_v23 }
 0x29c   : > { %v1077_v18 = vpop.eup %1076  ;;  %780 = vst.msk [vmem:[%s1506_s19 + $0x60] sm:$0xff] %vm767_vm1, %v754_v22  ;;  %1090 = vrcp.f32 %v724_v26 }
 0x29d   : > { %v1079_v19 = vpop.eup %1078  ;;  %v756_v27 = vmul.f32 %v1077_v18, %v1462_v41 }
 0x29e   : > { %v738_v28 = vmul.f32 %v1079_v19, %v1464_v30 }
 0x29f   : > { %781 = vst.msk [vmem:[%s1506_s19 + $0x68] sm:$0xff] %vm767_vm1, %v756_v27  ;;  %v708_v29 = vpop.xlane.xlu1 %707 }
 0x2a0   : > { %v1081_v32 = vpop.eup %1080  ;;  %772 = vst.msk [vmem:[%s1506_s19 + $0x20] sm:$0xff] %vm767_vm1, %v738_v28  ;;  %1092 = vrcp.f32 %v708_v29 }
 0x2a1   : > { %v1083_v25 = vpop.eup %1082  ;;  %v740_v33 = vmul.f32 %v1081_v32, %v1470_v49 }
 0x2a2   : > { %v758_v24 = vmul.f32 %v1083_v25, %v1472_v36  ;;  %v710_v34 = vpop.xlane.xlu0 %709 }
 0x2a3   : > { %773 = vst.msk [vmem:[%s1506_s19 + $0x28] sm:$0xff] %vm767_vm1, %v740_v33  ;;  %v728_v35 = vpop.xlane.xlu1 %727  ;;  %1094 = vrcp.f32 %v710_v34 }
 0x2a4   : > { %v1085_v39 = vpop.eup %1084  ;;  %782 = vst.msk [vmem:[%s1506_s19 + $0x70] sm:$0xff] %vm767_vm1, %v758_v24  ;;  %1096 = vrcp.f32 %v728_v35 }
 0x2a5   : > { %v1087_v40 = vpop.eup %1086  ;;  %v760_v41 = vmul.f32 %v1085_v39, %v1477_v37 }
 0x2a6   : > { %v742_v30 = vmul.f32 %v1087_v40, %v1479_v43  ;;  %v726_v31 = vpop.xlane.xlu0 %725 }
 0x2a7   : > { %783 = vst.msk [vmem:[%s1506_s19 + $0x78] sm:$0xff] %vm767_vm1, %v760_v41  ;;  %1098 = vrcp.f32 %v726_v31 }
 0x2a8   : > { %v1089_v42 = vpop.eup %1088  ;;  %774 = vst.msk [vmem:[%s1506_s19 + $0x30] sm:$0xff] %vm767_vm1, %v742_v30 }
 0x2a9   : > { %v1091_v45 = vpop.eup %1090  ;;  %v744_v46 = vmul.f32 %v1089_v42, %v1483_v55 }
 0x2aa   : > { %v762_v48 = vmul.f32 %v1091_v45, %v1485_v57 }
 0x2ab   : > { %775 = vst.msk [vmem:[%s1506_s19 + $0x38] sm:$0xff] %vm767_vm1, %v744_v46 }
 0x2ac   : > { %784 = vst.msk [vmem:[%s1506_s19 + $0x80] sm:$0xff] %vm767_vm1, %v762_v48 }
 0x2ad   : > { %v1093_v49 = vpop.eup %1092 }
 0x2ae   : > { %v746_v36 = vmul.f32 %v1093_v49, %v1489_v47 }
 0x2b0   : > { %v1095_v50 = vpop.eup %1094  ;;  %776 = vst.msk [vmem:[%s1506_s19 + $0x40] sm:$0xff] %vm767_vm1, %v746_v36 }
 0x2b1   : > { %v1097_v51 = vpop.eup %1096  ;;  %v748_v52 = vmul.f32 %v1095_v50, %v1492_v58 }
 0x2b2   : > { %v766_v53 = vmul.f32 %v1097_v51, %v1494_v2 }
 0x2b3   : > { %777 = vst.msk [vmem:[%s1506_s19 + $0x48] sm:$0xff] %vm767_vm1, %v748_v52 }
 0x2b4   : > { %v1099_v37 = vpop.eup %1098  ;;  %786 = vst.msk [vmem:[%s1506_s19 + $0x90] sm:$0xff] %vm767_vm1, %v766_v53 }
 0x2b5   : > { %v764_v43 = vmul.f32 %v1099_v37, %v1498_v54 }
 0x2b7   : > { %785 = vst.msk [vmem:[%s1506_s19 + $0x88] sm:$0xff] %vm767_vm1, %v764_v43 }
 0x2b8 PF: > { %s15_s18 = sadd.s32 1, %s1106_s18  }
 0x2b9   : > { %p12_p4 = scmp.ge.s32.totalorder %s15_s18, 4  }
 0x2bb   :  { %14 = sbr.rel (!%p12_p4) target bundleno = 1 (0x1), region = 70 }

</bundles_post_ra>
